<compile_context>
chip_gen: v5e
topology: v5e:2x2
jax: 0.10.0
libtpu: 0.0.40
codegen_flags: <defaults>
</compile_context>

<pallas_src>
import functools

import numpy as np
import jax
import jax.numpy as jnp
from jax.experimental import pallas as pl
from jax.experimental.pallas import tpu as pltpu


# Dense shift-sum matrix is used only when it is comfortably VMEM-resident
# (single-buffered) and the shift count is large enough that one
# (TB,HW)@(HW,HW) MXU matmul beats N_inv rolls + adds.
_DENSE_M_MAX_BYTES = 16 * 1024 * 1024   # M = HW*HW*4 bytes  ->  HW <= 2048
_DENSE_MIN_SHIFTS = 8                   # at/below this, per-shift rolls win


def _round_up(a, m):
    return ((a + m - 1) // m) * m


def _pick_tb(B):
    """Examples per grid step: fill the MXU M dim, keep >= 2 grid steps."""
    target = 256                        # MXU row width on v6e/v7x; fine on v5e
    if B <= 8:
        return B                        # single step; block == full batch dim
    return min(target, _round_up(pl.cdiv(B, 2), 8))   # multiple of 8 sublanes


def _vmem_limit_bytes(use_dense, TB, C, HW):
    elt = 4
    blk = (TB * C * HW + TB * HW + TB * C) * elt   # x + out + wy blocks
    need = 2 * blk                                 # double-buffered pipeline
    if use_dense:
        need += HW * HW * elt                      # single-buffered resident M
    need = int(need * 1.5) + (4 << 20)             # temporaries + headroom
    return int(min(max(need, 32 << 20), 100 << 20))


# ----------------------------- kernels -----------------------------
def _make_roll_kernel(shifts, n_inv, do_round):
    inv_n = 1.0 / float(n_inv)

    def kernel(wy_ref, x_ref, o_ref):
        # wy_ref: (TB, C)   x_ref: (TB, C, H, W)   o_ref: (TB, H, W)   all f32
        wy = wy_ref[...]
        x = x_ref[...]
        # Channel reduction hoisted out of the shift loop (roll commutes with
        # the per-channel linear combination and with elementwise ReLU).
        cam = jnp.sum(wy[:, :, None, None] * x, axis=1)          # (TB, H, W)
        cam = jnp.maximum(cam, 0.0)                              # ReLU once
        acc = jnp.zeros_like(cam)
        for dh, dw in shifts:                                    # static unroll
            if dh == 0 and dw == 0:
                acc = acc + cam
            else:
                acc = acc + jnp.roll(jnp.roll(cam, dw, axis=-1), dh, axis=-2)
        out = acc * inv_n
        if do_round:
            out = jnp.round(out)
        o_ref[...] = out

    return kernel


def _make_dense_kernel(n_inv, do_round):
    inv_n = 1.0 / float(n_inv)

    def kernel(wy_ref, x_ref, m_hbm_ref, o_ref, m_vmem):
        # wy_ref: (TB, C)  x_ref: (TB, C, HW)  m_hbm_ref: (HW, HW) in HBM
        # o_ref:  (TB, HW) m_vmem: (HW, HW) persistent single-buffered scratch
        @pl.when(pl.program_id(0) == 0)        # grid axis is "arbitrary"
        def _():
            pltpu.sync_copy(m_hbm_ref, m_vmem)   # fetch M exactly once

        wy = wy_ref[...]
        x = x_ref[...]
        cam = jnp.sum(wy[:, :, None] * x, axis=1)                # (TB, HW)
        cam = jnp.maximum(cam, 0.0)                              # ReLU before sum
        # Sum over all N_inv cyclic translations: one lane-dense MXU matmul.
        acc = jnp.dot(cam, m_vmem[...],
                      preferred_element_type=jnp.float32,
                      precision=jax.lax.Precision.HIGHEST)       # (TB, HW)
        out = acc * inv_n
        if do_round:
            out = jnp.round(out)
        o_ref[...] = out

    return kernel


# ----------------------- shift-sum matrix (host side, cached) ----------------
@functools.lru_cache(maxsize=16)
def _build_shift_sum_matrix(H, W, shifts):
    """M[p, q] = #shifts s such that rolling the CAM by s maps flat p -> flat q.

    cam_flat @ M == sum_s roll(cam, (dh_s, dw_s)) flattened, matching jnp.roll's
    positive-shift convention: out[h, w] = cam[(h-dh)%H, (w-dw)%W].
    """
    hw = H * W
    M = np.zeros((hw, hw), np.float32)
    qh, qw = np.meshgrid(np.arange(H), np.arange(W), indexing="ij")
    q = (qh * W + qw).reshape(-1)
    for dh, dw in shifts:
        p = (((qh - dh) % H) * W + ((qw - dw) % W)).reshape(-1)
        np.add.at(M, (p, q), 1.0)
    return jnp.asarray(M)


# ----------------------------- wrapper -----------------------------
def invariant_explainer(x, y, w_cls, shifts, n_inv, do_round, force_path="auto"):
    """Pallas-backed InvariantExplainer.forward.

    x:      (B, C, H, W) float32   NCHW
    y:      (B,)         int32     class labels
    w_cls:  (K, C)       float32   explainer (CAM) per-class channel weights
    shifts: tuple of (dh, dw) cyclic translations, len == n_inv, first is (0, 0)
    """
    B, C, H, W = x.shape
    HW = H * W
    shifts = tuple((int(dh), int(dw)) for dh, dw in shifts)
    assert len(shifts) == n_inv

    wy = w_cls[y].astype(jnp.float32)               # (B, C) class-weight gather

    dense_ok = (HW % 128 == 0) and (HW * HW * 4 <= _DENSE_M_MAX_BYTES)
    if force_path == "dense":
        assert dense_ok, "dense path needs HW % 128 == 0 and a small enough M"
        use_dense = True
    elif force_path == "roll":
        use_dense = False
    else:
        use_dense = dense_ok and (n_inv > _DENSE_MIN_SHIFTS)

    TB = _pick_tb(B)
    B_pad = _round_up(B, TB)
    n_steps = B_pad // TB

    x_in = (x.reshape(B, C, HW) if use_dense else x).astype(jnp.float32)
    wy_in = wy
    if B_pad != B:                                   # zero rows -> zero outputs
        wy_in = jnp.pad(wy_in, ((0, B_pad - B), (0, 0)))
        x_in = jnp.pad(x_in, ((0, B_pad - B),) + ((0, 0),) * (x_in.ndim - 1))

    params = pltpu.CompilerParams(
        # Dense path: "arbitrary" so the step-0 one-shot M copy is guaranteed
        # to run first on the executing core. Roll path: "parallel" (megacore).
        dimension_semantics=("arbitrary",) if use_dense else ("parallel",),
        vmem_limit_bytes=_vmem_limit_bytes(use_dense, TB, C, HW),
    )

    if use_dense:
        M = _build_shift_sum_matrix(H, W, shifts)    # cached across calls
        out = pl.pallas_call(
            _make_dense_kernel(n_inv, do_round),
            out_shape=jax.ShapeDtypeStruct((B_pad, HW), jnp.float32),
            grid=(n_steps,),
            in_specs=[
                pl.BlockSpec((TB, C), lambda b: (b, 0)),          # wy
                pl.BlockSpec((TB, C, HW), lambda b: (b, 0, 0)),   # x (lane-dense)
                pl.BlockSpec(memory_space=pl.ANY),                # M stays in HBM
            ],
            out_specs=pl.BlockSpec((TB, HW), lambda b: (b, 0)),   # dense slab
            scratch_shapes=[pltpu.VMEM((HW, HW), jnp.float32)],   # resident M
            compiler_params=params,
        )(wy_in, x_in, M)
        return out[:B].reshape(B, H, W)

    out = pl.pallas_call(
        _make_roll_kernel(shifts, n_inv, do_round),
        out_shape=jax.ShapeDtypeStruct((B_pad, H, W), jnp.float32),
        grid=(n_steps,),
        in_specs=[
            pl.BlockSpec((TB, C), lambda b: (b, 0)),              # wy
            pl.BlockSpec((TB, C, H, W), lambda b: (b, 0, 0, 0)),  # x
        ],
        out_specs=pl.BlockSpec((TB, H, W), lambda b: (b, 0, 0)),
        compiler_params=params,
    )(wy_in, x_in)
    return out[:B]


# ----------------------------- pure-JAX reference -----------------------------
def _explainer_ref(x, wy):
    # ReLU(sum_c wy[b,c] * x[b,c,h,w]), exact f32 (no matmul)
    return jnp.maximum(jnp.sum(wy[:, :, None, None] * x, axis=1), 0.0)


def _ref(x, y, w_cls, shifts, n_inv, do_round):
    wy = w_cls[y].astype(jnp.float32)
    acc = jnp.zeros((x.shape[0],) + x.shape[2:], jnp.float32)
    for dh, dw in shifts:
        xs = jnp.roll(jnp.roll(x, dw, axis=3), dh, axis=2)
        acc = acc + _explainer_ref(xs, wy)
    out = acc.astype(jnp.float32) / n_inv
    if do_round:
        out = jnp.round(out)
    return out


if __name__ == "__main__":
    B, C, H, W = 2, 4, 16, 16
    K = 3              # number of classes
    N_INV = 4
    ROUND = False

    key = jax.random.PRNGKey(0)
    kx, kw = jax.random.split(key)
    x = jax.random.normal(kx, (B, C, H, W), dtype=jnp.float32)
    y = jnp.array([1, 2], dtype=jnp.int32)
    w_cls = jax.random.normal(kw, (K, C), dtype=jnp.float32)

    # identity + (N_inv - 1) deterministic cyclic translations (dh, dw)
    shifts = ((0, 0), (1, 3), (5, 7), (8, 2))

    expected = _ref(x, y, w_cls, shifts, N_INV, ROUND)

    # Default dispatch: small N_inv -> per-shift roll path (no M matrix).
    out = jax.block_until_ready(
        invariant_explainer(x, y, w_cls, shifts, N_INV, ROUND))
    assert out.shape == (B, H, W) and out.dtype == jnp.float32
    assert jnp.allclose(out, expected, atol=1e-4, rtol=1e-4), "roll path mismatch"

    # Dense shift-sum-matrix path, exercised explicitly (single-buffered M).
    out_dense = jax.block_until_ready(
        invariant_explainer(x, y, w_cls, shifts, N_INV, ROUND, force_path="dense"))
    assert out_dense.shape == (B, H, W) and out_dense.dtype == jnp.float32
    assert jnp.allclose(out_dense, expected, atol=1e-4, rtol=1e-4), "dense path mismatch"

    print("KERNEL_OK")
</pallas_src>

<mosaic_0001>
module attributes {stable_mosaic.version = 11 : i64} {
  func.func @kernel(%arg0: i32, %arg1: memref<2x4xf32, #tpu.memory_space<vmem>>, %arg2: memref<2x4x16x16xf32, #tpu.memory_space<vmem>>, %arg3: memref<2x16x16xf32, #tpu.memory_space<vmem>>) attributes {dimension_semantics = [#tpu.dimension_semantics<parallel>], iteration_bounds = array<i64: 1>, scalar_prefetch = 0 : i64, scratch_operands = 0 : i64, tpu.core_type = #tpu.core_type<tc>, window_params = [{transform_indices = @transform_0, window_bounds = array<i64: 2, 4>}, {transform_indices = @transform_1, window_bounds = array<i64: 2, 4, 16, 16>}, {transform_indices = @transform_2, window_bounds = array<i64: 2, 16, 16>}]} {
    %c0 = arith.constant 0 : index
    %c0_0 = arith.constant 0 : index
    %0 = vector.load %arg1[%c0, %c0_0] : memref<2x4xf32, #tpu.memory_space<vmem>>, vector<2x4xf32>
    %c0_1 = arith.constant 0 : index
    %c0_2 = arith.constant 0 : index
    %c0_3 = arith.constant 0 : index
    %c0_4 = arith.constant 0 : index
    %1 = vector.load %arg2[%c0_1, %c0_2, %c0_3, %c0_4] : memref<2x4x16x16xf32, #tpu.memory_space<vmem>>, vector<2x4x16x16xf32>
    %2 = vector.shape_cast %0 : vector<2x4xf32> to vector<2x4x1x1xf32>
    %3 = vector.broadcast %2 : vector<2x4x1x1xf32> to vector<2x4x16x16xf32>
    %4 = arith.mulf %3, %1 : vector<2x4x16x16xf32>
    %cst = arith.constant dense<0.000000e+00> : vector<2x16x16xf32>
    %5 = vector.multi_reduction <add>, %4, %cst [1] : vector<2x4x16x16xf32> to vector<2x16x16xf32>
    %cst_5 = arith.constant 0.000000e+00 : f32
    %6 = vector.broadcast %cst_5 : f32 to vector<2x16x16xf32>
    %7 = arith.maximumf %5, %6 : vector<2x16x16xf32>
    %cst_6 = arith.constant 0.000000e+00 : f32
    %8 = vector.broadcast %cst_6 : f32 to vector<2x16x16xf32>
    %9 = arith.addf %8, %7 : vector<2x16x16xf32>
    %10 = vector.extract_strided_slice %7 {offsets = [0, 0, 13], sizes = [2, 16, 3], strides = [1, 1, 1]} : vector<2x16x16xf32> to vector<2x16x3xf32>
    %11 = vector.extract_strided_slice %7 {offsets = [0, 0, 0], sizes = [2, 16, 13], strides = [1, 1, 1]} : vector<2x16x16xf32> to vector<2x16x13xf32>
    %12 = tpu.concatenate %10, %11 in 2 : vector<2x16x3xf32>, vector<2x16x13xf32> -> vector<2x16x16xf32>
    %13 = vector.extract_strided_slice %12 {offsets = [0, 15, 0], sizes = [2, 1, 16], strides = [1, 1, 1]} : vector<2x16x16xf32> to vector<2x1x16xf32>
    %14 = vector.extract_strided_slice %12 {offsets = [0, 0, 0], sizes = [2, 15, 16], strides = [1, 1, 1]} : vector<2x16x16xf32> to vector<2x15x16xf32>
    %15 = tpu.concatenate %13, %14 in 1 : vector<2x1x16xf32>, vector<2x15x16xf32> -> vector<2x16x16xf32>
    %16 = arith.addf %9, %15 : vector<2x16x16xf32>
    %17 = vector.extract_strided_slice %7 {offsets = [0, 0, 9], sizes = [2, 16, 7], strides = [1, 1, 1]} : vector<2x16x16xf32> to vector<2x16x7xf32>
    %18 = vector.extract_strided_slice %7 {offsets = [0, 0, 0], sizes = [2, 16, 9], strides = [1, 1, 1]} : vector<2x16x16xf32> to vector<2x16x9xf32>
    %19 = tpu.concatenate %17, %18 in 2 : vector<2x16x7xf32>, vector<2x16x9xf32> -> vector<2x16x16xf32>
    %20 = vector.extract_strided_slice %19 {offsets = [0, 11, 0], sizes = [2, 5, 16], strides = [1, 1, 1]} : vector<2x16x16xf32> to vector<2x5x16xf32>
    %21 = vector.extract_strided_slice %19 {offsets = [0, 0, 0], sizes = [2, 11, 16], strides = [1, 1, 1]} : vector<2x16x16xf32> to vector<2x11x16xf32>
    %22 = tpu.concatenate %20, %21 in 1 : vector<2x5x16xf32>, vector<2x11x16xf32> -> vector<2x16x16xf32>
    %23 = arith.addf %16, %22 : vector<2x16x16xf32>
    %24 = vector.extract_strided_slice %7 {offsets = [0, 0, 14], sizes = [2, 16, 2], strides = [1, 1, 1]} : vector<2x16x16xf32> to vector<2x16x2xf32>
    %25 = vector.extract_strided_slice %7 {offsets = [0, 0, 0], sizes = [2, 16, 14], strides = [1, 1, 1]} : vector<2x16x16xf32> to vector<2x16x14xf32>
    %26 = tpu.concatenate %24, %25 in 2 : vector<2x16x2xf32>, vector<2x16x14xf32> -> vector<2x16x16xf32>
    %27 = vector.extract_strided_slice %26 {offsets = [0, 8, 0], sizes = [2, 8, 16], strides = [1, 1, 1]} : vector<2x16x16xf32> to vector<2x8x16xf32>
    %28 = vector.extract_strided_slice %26 {offsets = [0, 0, 0], sizes = [2, 8, 16], strides = [1, 1, 1]} : vector<2x16x16xf32> to vector<2x8x16xf32>
    %29 = tpu.concatenate %27, %28 in 1 : vector<2x8x16xf32>, vector<2x8x16xf32> -> vector<2x16x16xf32>
    %30 = arith.addf %23, %29 : vector<2x16x16xf32>
    %cst_7 = arith.constant 2.500000e-01 : f32
    %31 = vector.broadcast %cst_7 : f32 to vector<2x16x16xf32>
    %32 = arith.mulf %30, %31 : vector<2x16x16xf32>
    %c0_8 = arith.constant 0 : index
    %c0_9 = arith.constant 0 : index
    %c0_10 = arith.constant 0 : index
    %33 = vector.load %arg3[%c0_8, %c0_9, %c0_10] : memref<2x16x16xf32, #tpu.memory_space<vmem>>, vector<2x16x16xf32>
    tpu.vector_store %arg3[%c0_8, %c0_9, %c0_10], %32 {strides = array<i32>} : memref<2x16x16xf32, #tpu.memory_space<vmem>>, vector<2x16x16xf32>,
    return
  }
  func.func @transform_0(%arg0: i32) -> (i32, i32) {
    %c0_i32 = arith.constant 0 : i32
    %c0_i32_0 = arith.constant 0 : i32
    return %arg0, %c0_i32 : i32, i32
  }
  func.func @transform_1(%arg0: i32) -> (i32, i32, i32, i32) {
    %c0_i32 = arith.constant 0 : i32
    %c0_i32_0 = arith.constant 0 : i32
    %c0_i32_1 = arith.constant 0 : i32
    %c0_i32_2 = arith.constant 0 : i32
    return %arg0, %c0_i32, %c0_i32_0, %c0_i32_1 : i32, i32, i32, i32
  }
  func.func @transform_2(%arg0: i32) -> (i32, i32, i32) {
    %c0_i32 = arith.constant 0 : i32
    %c0_i32_0 = arith.constant 0 : i32
    %c0_i32_1 = arith.constant 0 : i32
    return %arg0, %c0_i32, %c0_i32_0 : i32, i32, i32
  }
}

</mosaic_0001>

<bundles_post_ra>
// kernel: tpu_custom_call.1
= control target key start
LH: loop header
LB: loop body
LE: loop exit
PB: predicated region body
PF: predicated region fallthrough
CT: control target
= control target key end

     0   :  { %7 = vsyncpa [#allocation3], 0  ;;  %s506_s0 = inlined_call_operand.hbm [shape: f32[2,4], index: 0, kind: input, shape index: {}]   ;;  %s507_s1 = inlined_call_operand.hbm [shape: f32[2,4,16,16], index: 1, kind: input, shape index: {}]   ;;  %s508_s2 = inlined_call_operand.hbm [shape: f32[2,16,16], index: 2, kind: output, shape index: {}]  }
   0x1   :  { %8 = vsyncpa [#allocation6], 0 }
   0x2   :  { %9 = vsyncpa [#allocation4], 0  ;;  %s15_s11 = sshll.u32 %s506_s0, 4  ;;  %s393_s12 = smov [#allocation2]   ;;  %s16_s11 = int_to_ptr.hbm [resolvable:$true] %s15_s11 }
   0x3   :  { %s17_s13 = sshll.u32 %s393_s12, 4  ;;  %s25_s16 = sshll.u32 %s507_s1, 4  ;;  %s18_s13 = int_to_ptr.vmem [resolvable:$true] %s17_s13  ;;  %s26_s16 = int_to_ptr.hbm [resolvable:$true] %s25_s16 }
   0x4   :  { %20 = dma.hbm_to_vmem [thread:$0]  %s16_s11, 32, %s18_s13, [#allocation3]  }
   0x5   :  { %s394_s17 = smov [#allocation5]   ;;  %s395_s19 = smov 128  }
   0x6   :  { %s27_s18 = sshll.u32 %s394_s17, 4  ;;  %s396_s20 = smov 8   ;;  %s28_s18 = int_to_ptr.vmem [resolvable:$true] %s27_s18 }
   0x7   :  { %33 = dma.hbm_to_vmem [thread:$0]  %s26_s16, 2048, %s28_s18, [#allocation6], %s395_s19, %s395_s19, %s396_s20  }
   0x8   :  { %387 = dma.done.wait [#allocation3], 32  }
   0x9   :  { %388 = vsyncadd [#allocation3], 4294967264 }
   0xa   :  { %389 = dma.done.wait [#allocation6], 2048  }
   0xb   :  { %390 = vsyncadd [#allocation6], 4294965248  ;;  %v60_v0 = vlaneseq  ;;  %v42_v2 = vld [vmem:[#allocation2] sm:$0x3]  ;;  %v43_v5 = vld [vmem:[#allocation5] sm:$0xff]  ;;  %vm97_vm0 = vcmask 130048  }
   0xc   :  { %v59_v3 = vperm.slane %v42_v2, 0  ;;  %v66_v4 = vperm.slane %v42_v2, 1  ;;  %v44_v6 = vld [vmem:[#allocation5 + $0x8] sm:$0xff]  ;;  %v45_v7 = vld [vmem:[#allocation5 + $0x10] sm:$0xff]  ;;  %v46_v8 = vld [vmem:[#allocation5 + $0x18] sm:$0xff]  ;;  %s397_s0 = smov 3  }
   0xd   :  { %v61_v1 = vshrl.u32 %v60_v0, 7  ;;  %v47_v10 = vld [vmem:[#allocation5 + $0x20] sm:$0xff]  ;;  %v49_v11 = vld [vmem:[#allocation5 + $0x30] sm:$0xff]  ;;  %v48_v16 = vld [vmem:[#allocation5 + $0x28] sm:$0xff]  ;;  %s398_s1 = smov 115   ;;  %s399_s21 = smov 119  }
   0xe   :  { %v50_v29 = vld [vmem:[#allocation5 + $0x38] sm:$0xff]  ;;  %v51_v31 = vld [vmem:[#allocation5 + $0x40] sm:$0xff]  ;;  %v52_v35 = vld [vmem:[#allocation5 + $0x48] sm:$0xff]  ;;  %s400_s22 = smov 7   ;;  %s401_s23 = smov 114   ;;  %vm162_vm1 = vcmask 23552  }
   0xf   :  { %314 = vset.pattern.permute.xlu0 %v61_v1  ;;  %v53_v36 = vld [vmem:[#allocation5 + $0x50] sm:$0xff]  ;;  %v54_v37 = vld [vmem:[#allocation5 + $0x58] sm:$0xff]  ;;  %v55_v39 = vld [vmem:[#allocation5 + $0x60] sm:$0xff]  ;;  %s402_s24 = smov 2   ;;  %vm214_vm2 = vcmask 56320   ;;  %vm175_vm3 = vcmask 1040384  }
  0x10   :  { %v56_v40 = vld [vmem:[#allocation5 + $0x68] sm:$0xff]  ;;  %v57_v48 = vld [vmem:[#allocation5 + $0x70] sm:$0xff]  ;;  %v58_v49 = vld [vmem:[#allocation5 + $0x78] sm:$0xff]  ;;  %vm227_vm4 = vcmask 1044480   ;;  %vm266_vm5 = vcmask 15360   ;;  %s403_s25 = smov [#allocation7]  }
  0x11   :  { %s287_s26 = sshll.u32 %s403_s25, 4  ;;  %s289_s29 = sshll.u32 %s508_s2, 4  ;;  %s288_s26 = int_to_ptr.vmem [resolvable:$true] %s287_s26  ;;  %s290_s29 = int_to_ptr.hbm [resolvable:$true] %s289_s29 }
  0x17   :  { %64 = vperm.xlu0 %314, %v59_v3  }
  0x1f   :  { %71 = vperm.xlu0 %314, %v66_v4  }
  0x89   :  { %v65_v9 = vpop.permute.xlu0 %64 }
  0x8a   :  { %v73_v12 = vperm.slane %v65_v9, 0  ;;  %v74_v13 = vperm.slane %v65_v9, 1  ;;  %v75_v14 = vperm.slane %v65_v9, 2  ;;  %v76_v15 = vperm.slane %v65_v9, 3 }
  0x8c   :  { %v81_v17 = vmul.f32 %v73_v12, %v43_v5  ;;  %v82_v18 = vmul.f32 %v73_v12, %v44_v6  ;;  %v83_v19 = vmul.f32 %v74_v13, %v45_v7  ;;  %v84_v20 = vmul.f32 %v74_v13, %v46_v8 }
  0x8d   :  { %v85_v21 = vmul.f32 %v75_v14, %v47_v10  ;;  %v87_v22 = vmul.f32 %v76_v15, %v49_v11  ;;  %v86_v27 = vmul.f32 %v75_v14, %v48_v16  ;;  %v88_v45 = vmul.f32 %v76_v15, %v50_v29 }
  0x8e   :  { %v98_v23 = vsel %vm97_vm0, %v81_v17, 0.0  ;;  %v99_v24 = vsel %vm97_vm0, %v83_v19, 0.0  ;;  %v105_v25 = vsel %vm97_vm0, %v82_v18, 0.0  ;;  %v106_v26 = vsel %vm97_vm0, %v84_v20, 0.0 }
  0x8f   :  { %v100_v28 = vadd.f32 %v99_v24, %v98_v23  ;;  %v101_v30 = vsel %vm97_vm0, %v85_v21, 0.0  ;;  %v103_v33 = vsel %vm97_vm0, %v87_v22, 0.0  ;;  %v107_v34 = vadd.f32 %v106_v26, %v105_v25 }
  0x90   :  { %v108_v47 = vsel %vm97_vm0, %v86_v27, 0.0  ;;  %v110_v1 = vsel %vm97_vm0, %v88_v45, 0.0 }
  0x91   :  { %v102_v32 = vadd.f32 %v101_v30, %v100_v28  ;;  %v72_v38 = vpop.permute.xlu0 %71  ;;  %v109_v54 = vadd.f32 %v108_v47, %v107_v34 }
  0x92   :  { %v77_v41 = vperm.slane %v72_v38, 0  ;;  %v78_v42 = vperm.slane %v72_v38, 1  ;;  %v79_v43 = vperm.slane %v72_v38, 2  ;;  %v80_v44 = vperm.slane %v72_v38, 3 }
  0x93   :  { %v104_v46 = vadd.f32 %v103_v33, %v102_v32  ;;  %v111_v4 = vadd.f32 %v110_v1, %v109_v54 }
  0x94   :  { %v89_v50 = vmul.f32 %v77_v41, %v51_v31  ;;  %v90_v51 = vmul.f32 %v77_v41, %v52_v35  ;;  %v91_v52 = vmul.f32 %v78_v42, %v53_v36  ;;  %v92_v53 = vmul.f32 %v78_v42, %v54_v37 }
  0x95   :  { %v435_v55 = vmax.f32 %v104_v46, 0.0  ;;  %v93_v56 = vmul.f32 %v79_v43, %v55_v39  ;;  %v94_v57 = vmul.f32 %v79_v43, %v56_v40  ;;  %v95_v58 = vmul.f32 %v80_v44, %v57_v48 }
  0x96   :  { %v112_v59 = vsel %vm97_vm0, %v89_v50, 0.0  ;;  %v113_v60 = vsel %vm97_vm0, %v91_v52, 0.0  ;;  %v96_v61 = vmul.f32 %v80_v44, %v58_v49  ;;  %v119_v63 = vsel %vm97_vm0, %v90_v51, 0.0 }
  0x97   :  { %v114_v62 = vadd.f32 %v113_v60, %v112_v59  ;;  %v120_v0 = vsel %vm97_vm0, %v92_v53, 0.0  ;;  %150 = vrot.lane.b32.xlu0 %v435_v55, %s397_s0  ;;  %138 = vrot.lane.b32.xlu1 %v435_v55, %s398_s1  ;;  %v115_v2 = vsel %vm97_vm0, %v93_v56, 0.0  ;;  %v122_v6 = vsel %vm97_vm0, %v94_v57, 0.0 }
  0x98   :  { %v121_v3 = vadd.f32 %v120_v0, %v119_v63  ;;  %v117_v7 = vsel %vm97_vm0, %v95_v58, 0.0  ;;  %v124_v10 = vsel %vm97_vm0, %v96_v61, 0.0  ;;  %v448_v12 = vmax.f32 %v111_v4, 0.0 }
  0x99   :  { %v116_v5 = vadd.f32 %v115_v2, %v114_v62 }
  0x9a   :  { %v123_v8 = vadd.f32 %v122_v6, %v121_v3 }
  0x9b   :  { %v118_v9 = vadd.f32 %v117_v7, %v116_v5 }
  0x9c   :  { %v125_v11 = vadd.f32 %v124_v10, %v123_v8 }
  0x9d   :  { %v450_v13 = vmax.f32 %v118_v9, 0.0 }
  0x9e   :  { %v452_v14 = vmax.f32 %v125_v11, 0.0 }
  0x9f   :  { %140 = vrot.lane.b32.xlu1 %v448_v12, %s398_s1  ;;  %142 = vrot.lane.b32.xlu2 %v450_v13, %s398_s1 }
  0xa0   :  { %156 = vrot.lane.b32.xlu0 %v452_v14, %s397_s0 }
  0xa7   :  { %152 = vrot.lane.b32.xlu1 %v448_v12, %s397_s0  ;;  %144 = vrot.lane.b32.xlu2 %v452_v14, %s398_s1 }
  0xa8   :  { %194 = vrot.lane.b32.xlu0 %v450_v13, %s399_s21 }
  0xaf   :  { %190 = vrot.lane.b32.xlu1 %v435_v55, %s399_s21  ;;  %154 = vrot.lane.b32.xlu2 %v450_v13, %s397_s0 }
  0xb0   :  { %204 = vrot.lane.b32.xlu0 %v448_v12, %s400_s22 }
  0xb7   :  { %196 = vrot.lane.b32.xlu1 %v452_v14, %s399_s21  ;;  %192 = vrot.lane.b32.xlu2 %v448_v12, %s399_s21 }
  0xb8   :  { %242 = vrot.lane.b32.xlu0 %v435_v55, %s401_s23 }
  0xbf   :  { %206 = vrot.lane.b32.xlu1 %v450_v13, %s400_s22  ;;  %202 = vrot.lane.b32.xlu2 %v435_v55, %s400_s22 }
  0xc0   :  { %248 = vrot.lane.b32.xlu0 %v452_v14, %s401_s23 }
  0xc7   :  { %244 = vrot.lane.b32.xlu1 %v448_v12, %s401_s23  ;;  %208 = vrot.lane.b32.xlu2 %v452_v14, %s400_s22 }
  0xc8   :  { %258 = vrot.lane.b32.xlu0 %v450_v13, %s402_s24 }
  0xcf   :  { %254 = vrot.lane.b32.xlu1 %v435_v55, %s402_s24  ;;  %246 = vrot.lane.b32.xlu2 %v450_v13, %s401_s23 }
  0xd7   :  { %260 = vrot.lane.b32.xlu1 %v452_v14, %s402_s24  ;;  %256 = vrot.lane.b32.xlu2 %v448_v12, %s402_s24 }
  0xf9   :  { %v143_v15 = vpop.permute.xlu2 %142 }
 0x101   :  { %v145_v16 = vpop.permute.xlu2 %144 }
 0x109   :  { %v139_v17 = vpop.permute.xlu1 %138  ;;  %v155_v18 = vpop.permute.xlu2 %154 }
 0x10a   :  { %v151_v19 = vpop.permute.xlu0 %150  ;;  %v165_v37 = vsel %vm162_vm1, %v143_v15, %v155_v18 }
 0x10b   :  { %v163_v32 = vsel %vm162_vm1, %v139_v17, %v151_v19  ;;  %v178_v47 = vrot.slane %v165_v37, 7 }
 0x10c   :  { %v176_v39 = vrot.slane %v163_v32, 7 }
 0x111   :  { %v141_v20 = vpop.permute.xlu1 %140  ;;  %v193_v21 = vpop.permute.xlu2 %192 }
 0x112   :  { %v157_v22 = vpop.permute.xlu0 %156 }
 0x113   :  { %v166_v33 = vsel %vm162_vm1, %v145_v16, %v157_v22 }
 0x114   :  { %v170_v40 = vrot.slane %v166_v33, 7 }
 0x116   :  { %v179_v50 = vsel %vm175_vm3, %v178_v47, %v170_v40  ;;  %v185_v10 = vsel %vm175_vm3, %v170_v40, %v178_v47 }
 0x117   :  { %v189_v56 = vadd.f32 %v179_v50, %v452_v14  ;;  %v188_v15 = vadd.f32 %v185_v10, %v450_v13 }
 0x119   :  { %v153_v23 = vpop.permute.xlu1 %152  ;;  %v203_v25 = vpop.permute.xlu2 %202 }
 0x11a   :  { %v195_v24 = vpop.permute.xlu0 %194  ;;  %v164_v31 = vsel %vm162_vm1, %v141_v20, %v153_v23 }
 0x11b   :  { %v169_v38 = vrot.slane %v164_v31, 7 }
 0x11d   :  { %v184_v49 = vsel %vm175_vm3, %v169_v38, %v176_v39  ;;  %v177_v1 = vsel %vm175_vm3, %v176_v39, %v169_v38 }
 0x11e   :  { %v186_v53 = vadd.f32 %v184_v49, %v435_v55  ;;  %v187_v5 = vadd.f32 %v177_v1, %v448_v12 }
 0x121   :  { %v191_v26 = vpop.permute.xlu1 %190  ;;  %v209_v28 = vpop.permute.xlu2 %208 }
 0x122   :  { %v205_v27 = vpop.permute.xlu0 %204  ;;  %v215_v34 = vsel %vm214_vm2, %v191_v26, %v203_v25 }
 0x123   :  { %v216_v35 = vsel %vm214_vm2, %v193_v21, %v205_v27  ;;  %v228_v42 = vrot.slane %v215_v34, 3 }
 0x124   :  { %v221_v43 = vrot.slane %v216_v35, 3 }
 0x126   :  { %v236_v52 = vsel %vm227_vm4, %v221_v43, %v228_v42  ;;  %v229_v55 = vsel %vm227_vm4, %v228_v42, %v221_v43 }
 0x127   :  { %v238_v59 = vadd.f32 %v236_v52, %v186_v53  ;;  %v239_v7 = vadd.f32 %v229_v55, %v187_v5 }
 0x129   :  { %v197_v29 = vpop.permute.xlu1 %196  ;;  %v247_v36 = vpop.permute.xlu2 %246 }
 0x12a   :  { %v243_v30 = vpop.permute.xlu0 %242  ;;  %v218_v44 = vsel %vm214_vm2, %v197_v29, %v209_v28 }
 0x12b   :  { %v222_v51 = vrot.slane %v218_v44, 3 }
 0x131   :  { %v207_v41 = vpop.permute.xlu1 %206  ;;  %v257_v57 = vpop.permute.xlu2 %256 }
 0x132   :  { %v217_v45 = vsel %vm214_vm2, %v195_v24, %v207_v41  ;;  %v249_v46 = vpop.permute.xlu0 %248 }
 0x133   :  { %v230_v48 = vrot.slane %v217_v45, 3 }
 0x135   :  { %v231_v54 = vsel %vm227_vm4, %v230_v48, %v222_v51  ;;  %v237_v14 = vsel %vm227_vm4, %v222_v51, %v230_v48 }
 0x136   :  { %v241_v61 = vadd.f32 %v231_v54, %v189_v56  ;;  %v240_v17 = vadd.f32 %v237_v14, %v188_v15 }
 0x139   :  { %v245_v58 = vpop.permute.xlu1 %244 }
 0x13a   :  { %v268_v60 = vsel %vm266_vm5, %v245_v58, %v257_v57  ;;  %v259_v62 = vpop.permute.xlu0 %258 }
 0x13b   :  { %v271_v63 = vadd.f32 %v268_v60, %v238_v59  ;;  %v269_v0 = vsel %vm266_vm5, %v247_v36, %v259_v62 }
 0x13c   :  { %v274_v2 = vadd.f32 %v269_v0, %v241_v61 }
 0x13d   :  { %v275_v3 = vmul.f32 0.25, %v271_v63 }
 0x13e   :  { %v278_v4 = vmul.f32 0.25, %v274_v2 }
 0x13f   :  { %279 = vst.msk [vmem:[#allocation7] sm:$0xff] %vm97_vm0, %v275_v3 }
 0x140   :  { %282 = vst.msk [vmem:[#allocation7 + $0x18] sm:$0xff] %vm97_vm0, %v278_v4 }
 0x141   :  { %v255_v6 = vpop.permute.xlu1 %254 }
 0x142   :  { %v267_v8 = vsel %vm266_vm5, %v243_v30, %v255_v6 }
 0x143   :  { %v272_v9 = vadd.f32 %v267_v8, %v239_v7 }
 0x145   :  { %v276_v11 = vmul.f32 0.25, %v272_v9 }
 0x147   :  { %280 = vst.msk [vmem:[#allocation7 + $0x8] sm:$0xff] %vm97_vm0, %v276_v11 }
 0x149   :  { %v261_v16 = vpop.permute.xlu1 %260 }
 0x14a   :  { %v270_v12 = vsel %vm266_vm5, %v249_v46, %v261_v16 }
 0x14b   :  { %v273_v18 = vadd.f32 %v270_v12, %v240_v17 }
 0x14d   :  { %v277_v19 = vmul.f32 0.25, %v273_v18 }
 0x14f   :  { %281 = vst.msk [vmem:[#allocation7 + $0x10] sm:$0xff] %vm97_vm0, %v277_v19 }
 0x150   :  { %295 = dma.vmem_to_hbm [thread:$0]  %s288_s26, 512, %s290_s29, [#allocation4], %s395_s19, %s395_s19, %s396_s20  }
 0x151   :  { %391 = dma.done.wait [#allocation4], 512  }
 0x152   :  { %392 = vsyncadd [#allocation4], 4294966784 }
 0x153   :  { %300 = vsyncpa [#allocation3], 1 }
 0x154   :  { %301 = vsyncpa [#allocation6], 1 }
 0x155   :  { %302 = vsyncpa [#allocation4], 1 }

</bundles_post_ra>
